<compile_context>
chip_gen: v7x
topology: tpu7x:2x2x1
jax: 0.10.0
libtpu: 0.0.40
codegen_flags: <defaults>
</compile_context>

<pallas_src>
import jax
import jax.numpy as jnp
from jax.experimental import pallas as pl
from jax.experimental.pallas import tpu as pltpu


def _round_up(x, m):
    return (x + m - 1) // m * m


def _cdiv(a, b):
    return (a + b - 1) // b


def discriminator_kernel(x_ref, w1_ref, b1_ref, w2_ref, b2_ref, o_ref):
    # Per grid step:
    #   x_ref : (TILE_B, D)    f32   streamed batch tile (cast to bf16 here)
    #   w1_ref: (Hp, D)        bf16  VMEM-resident (PyTorch layout: out x in)
    #   b1_ref: (Hp, 1)        f32   VMEM-resident
    #   w2_ref: (Hp, 1)        f32   VMEM-resident
    #   b2_ref: (1, 1)         f32   VMEM-resident
    #   o_ref : (1, 1, TILE_B) f32   lane-dense output row
    x_bf16 = x_ref[...].astype(jnp.bfloat16)

    # fc1 on the MXU, transposed: h[H, B] = W1 @ x^T (bf16 in, f32 accumulate).
    # lhs (W1) is in standard orientation; the rhs transpose is handled by the
    # MXU operand load, so the streamed x tile is never vxpose'd per step.
    h = jax.lax.dot_general(
        w1_ref[...], x_bf16,
        dimension_numbers=(((1,), (1,)), ((), ())),
        preferred_element_type=jnp.float32,
    )                                           # (Hp, TILE_B) f32
    h = h + b1_ref[...]                         # lane-broadcast bias (f32)
    h = jnp.where(h > 0, h, 0.1 * h)            # LeakyReLU(0.1) on the VPU

    # fc2 (output width 1): VPU multiply + sublane (XLU) reduce instead of an
    # N=1 MXU matmul; the result is already a lane-dense (1, TILE_B) row.
    y = jnp.sum(h * w2_ref[...], axis=0, keepdims=True) + b2_ref[...]

    # Exact sigmoid in f32: exp on the EUP, exact reciprocal (review request).
    s = pl.reciprocal(1.0 + jnp.exp(-y), approx=False)
    o_ref[...] = s.reshape(o_ref.shape).astype(o_ref.dtype)


def _choose_tile_b(B, D, Hp):
    """Largest batch tile that (a) amortizes the ~0.35us/step grid overhead,
    (b) keeps double-buffered f32 x tiles + the in-kernel bf16 cast + the
    (Hp, tile_b) f32 temporaries inside a ~20 MiB VMEM budget, and (c) leaves
    >=2 parallel tiles for v7x's two TensorCores when the batch allows."""
    if B <= 1024:
        return _round_up(B, 8)                   # single small tile
    per_row = D * (2 * 4 + 2) + 2 * Hp * 4 + 16  # bytes of VMEM per batch row
    cap = ((20 << 20) // per_row) // 128 * 128
    cap = max(256, min(4096, cap))
    num_tiles = max(2, _cdiv(B, cap))            # >=2 tiles: feed both v7x TCs
    return _round_up(_cdiv(B, num_tiles), 128)


def discriminator_forward(x, w1, b1, w2, b2, *, tile_b=None):
    """x: (B, D). Weights in PyTorch nn.Linear layout:
       w1: (H, D), b1: (H,), w2: (1, H), b2: (1,). Returns (B, 1) f32."""
    B, D = x.shape
    H = w1.shape[0]
    Hp = _round_up(H, 128)

    if tile_b is None:
        tile_b = _choose_tile_b(B, D, Hp)
    else:
        tile_b = max(8, _round_up(int(tile_b), 8))
    num_tiles = _cdiv(B, tile_b)
    Bp = num_tiles * tile_b

    # Stream x directly (f32, native D). Pad batch rows only if the tile does
    # not divide B -- no extra HBM traffic in the common (divisible) case.
    x_f32 = x.astype(jnp.float32)
    x_p = x_f32 if Bp == B else jnp.pad(x_f32, ((0, Bp - B), (0, 0)))

    # Small, VMEM-resident parameters. w1 is cast to bf16 once here (MXU
    # operand). Padded H rows are zero and their w2 entries are zero, so they
    # contribute nothing. Biases / w2 stay f32 for the f32 elementwise path.
    w1_p = jnp.zeros((Hp, D), jnp.bfloat16).at[:H, :].set(w1.astype(jnp.bfloat16))
    b1_p = jnp.zeros((Hp, 1), jnp.float32).at[:H, 0].set(b1.astype(jnp.float32))
    w2_p = jnp.zeros((Hp, 1), jnp.float32).at[:H, 0].set(
        w2.reshape(-1).astype(jnp.float32))
    b2_p = b2.reshape(1, 1).astype(jnp.float32)

    out = pl.pallas_call(
        discriminator_kernel,
        out_shape=jax.ShapeDtypeStruct((num_tiles, 1, tile_b), jnp.float32),
        grid_spec=pltpu.PrefetchScalarGridSpec(
            num_scalar_prefetch=0,
            grid=(num_tiles,),
            in_specs=[
                pl.BlockSpec((tile_b, D), lambda i: (i, 0)),   # x: streamed
                pl.BlockSpec((Hp, D), lambda i: (0, 0)),       # w1: resident
                pl.BlockSpec((Hp, 1), lambda i: (0, 0)),       # b1: resident
                pl.BlockSpec((Hp, 1), lambda i: (0, 0)),       # w2: resident
                pl.BlockSpec((1, 1), lambda i: (0, 0)),        # b2: resident
            ],
            out_specs=pl.BlockSpec((1, 1, tile_b), lambda i: (i, 0, 0)),
        ),
        compiler_params=pltpu.CompilerParams(
            dimension_semantics=("parallel",),
            # Raise v5e's 16 MiB scoped default to 32 MiB (the v6e/v7x default;
            # safe w.r.t. v7x's 64 MiB physical VMEM). The tile chooser keeps
            # actual usage to ~20 MiB, leaving pipeline headroom.
            vmem_limit_bytes=32 * 1024 * 1024,
        ),
    )(x_p, w1_p, b1_p, w2_p, b2_p)

    return out.reshape(Bp, 1)[:B]


def init_params(key, img_dim, num_hidden):
    # Mimic PyTorch's U(-1/sqrt(fan_in), 1/sqrt(fan_in)) init, PyTorch layouts.
    k1, k2, k3, k4 = jax.random.split(key, 4)
    bound1 = 1.0 / jnp.sqrt(img_dim)
    bound2 = 1.0 / jnp.sqrt(num_hidden)
    w1 = jax.random.uniform(k1, (num_hidden, img_dim), jnp.float32, -bound1, bound1)
    b1 = jax.random.uniform(k2, (num_hidden,), jnp.float32, -bound1, bound1)
    w2 = jax.random.uniform(k3, (1, num_hidden), jnp.float32, -bound2, bound2)
    b2 = jax.random.uniform(k4, (1,), jnp.float32, -bound2, bound2)
    return w1, b1, w2, b2


def _reference(x, w1, b1, w2, b2):
    h = x @ w1.T + b1
    h = jnp.where(h > 0, h, 0.1 * h)
    return jax.nn.sigmoid(h @ w2.T + b2)


if __name__ == "__main__":
    batch, img_dim, num_hidden = 8, 64, 128

    key = jax.random.PRNGKey(0)
    kx, kx2, kp = jax.random.split(key, 3)
    w1, b1, w2, b2 = init_params(kp, img_dim, num_hidden)

    fwd = jax.jit(discriminator_forward, static_argnames=("tile_b",))

    # Case 1: tiny batch, single tile.
    x = jax.random.normal(kx, (batch, img_dim), jnp.float32)
    out = fwd(x, w1, b1, w2, b2)
    jax.block_until_ready(out)
    ref = _reference(x, w1, b1, w2, b2)
    assert out.shape == (batch, 1)
    # bf16 MXU operands (f32 accumulate) -> loose tolerance.
    assert jnp.allclose(out, ref, atol=2e-2, rtol=2e-2)

    # Case 2: multi-tile grid + batch remainder (exercises the tiled path).
    batch2 = 300
    x2 = jax.random.normal(kx2, (batch2, img_dim), jnp.float32)
    out2 = fwd(x2, w1, b1, w2, b2, tile_b=128)
    jax.block_until_ready(out2)
    ref2 = _reference(x2, w1, b1, w2, b2)
    assert out2.shape == (batch2, 1)
    assert jnp.allclose(out2, ref2, atol=2e-2, rtol=2e-2)

    print("KERNEL_OK")
</pallas_src>

<mosaic_0001>
module attributes {stable_mosaic.version = 11 : i64} {
  func.func @discriminator_kernel(%arg0: i32, %arg1: memref<8x64xf32, #tpu.memory_space<vmem>>, %arg2: memref<128x64xbf16, #tpu.memory_space<vmem>>, %arg3: memref<128x1xf32, #tpu.memory_space<vmem>>, %arg4: memref<128x1xf32, #tpu.memory_space<vmem>>, %arg5: memref<1x1xf32, #tpu.memory_space<vmem>>, %arg6: memref<1x1x8xf32, #tpu.memory_space<vmem>>) attributes {dimension_semantics = [#tpu.dimension_semantics<parallel>], iteration_bounds = array<i64: 1>, scalar_prefetch = 0 : i64, scratch_operands = 0 : i64, tpu.core_type = #tpu.core_type<tc>, window_params = [{transform_indices = @transform_0, window_bounds = array<i64: 8, 64>}, {pipeline_mode = #tpu.pipeline_mode<synchronous>, transform_indices = @transform_1, window_bounds = array<i64: 128, 64>}, {pipeline_mode = #tpu.pipeline_mode<synchronous>, transform_indices = @transform_2, window_bounds = array<i64: 128, 1>}, {pipeline_mode = #tpu.pipeline_mode<synchronous>, transform_indices = @transform_3, window_bounds = array<i64: 128, 1>}, {pipeline_mode = #tpu.pipeline_mode<synchronous>, transform_indices = @transform_4, window_bounds = array<i64: 1, 1>}, {transform_indices = @transform_5, window_bounds = array<i64: 1, 1, 8>}]} {
    %c0 = arith.constant 0 : index
    %c0_0 = arith.constant 0 : index
    %0 = vector.load %arg1[%c0, %c0_0] : memref<8x64xf32, #tpu.memory_space<vmem>>, vector<8x64xf32>
    %1 = arith.truncf %0 : vector<8x64xf32> to vector<8x64xbf16>
    %c0_1 = arith.constant 0 : index
    %c0_2 = arith.constant 0 : index
    %2 = vector.load %arg2[%c0_1, %c0_2] : memref<128x64xbf16, #tpu.memory_space<vmem>>, vector<128x64xbf16>
    %cst = arith.constant dense<0.000000e+00> : vector<128x8xf32>
    %3 = tpu.matmul %2, %1, %cst {dimension_numbers = #tpu.dot_dimension_numbers<[1], [1], [0], [0], [0, 0, 1, 0], [], []>} : vector<128x64xbf16>, vector<8x64xbf16>, vector<128x8xf32> -> vector<128x8xf32>
    %c0_3 = arith.constant 0 : index
    %c0_4 = arith.constant 0 : index
    %4 = vector.load %arg3[%c0_3, %c0_4] : memref<128x1xf32, #tpu.memory_space<vmem>>, vector<128x1xf32>
    %5 = vector.broadcast %4 : vector<128x1xf32> to vector<128x8xf32>
    %6 = arith.addf %3, %5 : vector<128x8xf32>
    %cst_5 = arith.constant 0.000000e+00 : f32
    %7 = vector.broadcast %cst_5 : f32 to vector<128x8xf32>
    %8 = arith.cmpf ogt, %6, %7 : vector<128x8xf32>
    %cst_6 = arith.constant 1.000000e-01 : f32
    %9 = vector.broadcast %cst_6 : f32 to vector<128x8xf32>
    %10 = arith.mulf %9, %6 : vector<128x8xf32>
    %11 = arith.select %8, %6, %10 : vector<128x8xi1>, vector<128x8xf32>
    %c0_7 = arith.constant 0 : index
    %c0_8 = arith.constant 0 : index
    %12 = vector.load %arg4[%c0_7, %c0_8] : memref<128x1xf32, #tpu.memory_space<vmem>>, vector<128x1xf32>
    %13 = vector.broadcast %12 : vector<128x1xf32> to vector<128x8xf32>
    %14 = arith.mulf %11, %13 : vector<128x8xf32>
    %cst_9 = arith.constant dense<0.000000e+00> : vector<8xf32>
    %15 = vector.multi_reduction <add>, %14, %cst_9 [0] : vector<128x8xf32> to vector<8xf32>
    %16 = vector.shape_cast %15 : vector<8xf32> to vector<1x8xf32>
    %c0_10 = arith.constant 0 : index
    %c0_11 = arith.constant 0 : index
    %17 = vector.load %arg5[%c0_10, %c0_11] : memref<1x1xf32, #tpu.memory_space<vmem>>, vector<1x1xf32>
    %18 = vector.broadcast %17 : vector<1x1xf32> to vector<1x8xf32>
    %19 = arith.addf %16, %18 : vector<1x8xf32>
    %cst_12 = arith.constant 0.000000e+00 : f32
    %20 = vector.broadcast %cst_12 : f32 to vector<1x8xf32>
    %21 = arith.subf %20, %19 : vector<1x8xf32>
    %22 = math.exp %21 : vector<1x8xf32>
    %cst_13 = arith.constant 1.000000e+00 : f32
    %23 = vector.broadcast %cst_13 : f32 to vector<1x8xf32>
    %24 = arith.addf %23, %22 : vector<1x8xf32>
    %25 = tpu.reciprocal %24 : vector<1x8xf32> -> vector<1x8xf32>
    %26 = vector.shape_cast %25 : vector<1x8xf32> to vector<1x1x8xf32>
    %c0_14 = arith.constant 0 : index
    %c0_15 = arith.constant 0 : index
    %c0_16 = arith.constant 0 : index
    %27 = vector.load %arg6[%c0_14, %c0_15, %c0_16] : memref<1x1x8xf32, #tpu.memory_space<vmem>>, vector<1x1x8xf32>
    tpu.vector_store %arg6[%c0_14, %c0_15, %c0_16], %26 {strides = array<i32>} : memref<1x1x8xf32, #tpu.memory_space<vmem>>, vector<1x1x8xf32>,
    return
  }
  func.func @transform_0(%arg0: i32) -> (i32, i32) {
    %c0_i32 = arith.constant 0 : i32
    %c0_i32_0 = arith.constant 0 : i32
    return %arg0, %c0_i32 : i32, i32
  }
  func.func @transform_1(%arg0: i32) -> (i32, i32) {
    %c0_i32 = arith.constant 0 : i32
    %c0_i32_0 = arith.constant 0 : i32
    %c0_i32_1 = arith.constant 0 : i32
    return %c0_i32, %c0_i32_0 : i32, i32
  }
  func.func @transform_2(%arg0: i32) -> (i32, i32) {
    %c0_i32 = arith.constant 0 : i32
    %c0_i32_0 = arith.constant 0 : i32
    %c0_i32_1 = arith.constant 0 : i32
    return %c0_i32, %c0_i32_0 : i32, i32
  }
  func.func @transform_3(%arg0: i32) -> (i32, i32) {
    %c0_i32 = arith.constant 0 : i32
    %c0_i32_0 = arith.constant 0 : i32
    %c0_i32_1 = arith.constant 0 : i32
    return %c0_i32, %c0_i32_0 : i32, i32
  }
  func.func @transform_4(%arg0: i32) -> (i32, i32) {
    %c0_i32 = arith.constant 0 : i32
    %c0_i32_0 = arith.constant 0 : i32
    %c0_i32_1 = arith.constant 0 : i32
    return %c0_i32, %c0_i32_0 : i32, i32
  }
  func.func @transform_5(%arg0: i32) -> (i32, i32, i32) {
    %c0_i32 = arith.constant 0 : i32
    %c0_i32_0 = arith.constant 0 : i32
    %c0_i32_1 = arith.constant 0 : i32
    return %arg0, %c0_i32, %c0_i32_0 : i32, i32, i32
  }
}

</mosaic_0001>

<bundles_post_ra>
// kernel: discriminator_forward.1
= control target key start
LH: loop header
LB: loop body
LE: loop exit
PB: predicated region body
PF: predicated region fallthrough
CT: control target
= control target key end

     0   :  { %s853_s0 = inlined_call_operand.vmem [shape: f32[8,64], index: 0, kind: input, shape index: {}]   ;;  %s854_s1 = inlined_call_operand.vmem [shape: bf16[128,64], index: 1, kind: input, shape index: {}]   ;;  %s855_s2 = inlined_call_operand.vmem [shape: f32[128,1], index: 2, kind: input, shape index: {}]   ;;  %s856_s3 = inlined_call_operand.vmem [shape: f32[128,1], index: 3, kind: input, shape index: {}]   ;;  %s857_s4 = inlined_call_operand.<no memory space> [shape: f32[1,1], index: 4, kind: input, shape index: {}]   ;;  %s858_s5 = inlined_call_operand.hbm [shape: f32[1,1,8], index: 5, kind: output, shape index: {}]  }
   0x1   :  { %v10_v0 = vstv %s857_s4 }
   0x2   :  { %11 = vst [vmem:[#allocation2] sm:$0x1] %v10_v0 }
   0x3   :  { %v24_v1 = vld [vmem:[%s853_s0] sm:$0xff]  ;;  %vm178_vm0 = vcmask 523264   ;;  %v620_v4 = vmov 0   ;;  %v43_v5 = vld [vmem:[%s855_s2 + $0x8] sm:$0xff]  ;;  %v44_v9 = vld [vmem:[%s855_s2 + $0x10] sm:$0xff] }
   0x4   :  { %v42_v2 = vld [vmem:[%s855_s2] sm:$0xff]  ;;  %v25_v3 = vpack.c.bf16 %v24_v1, %v24_v1  ;;  %582 = vset.pattern.permute.xlu0 %v620_v4  ;;  %583 = vset.pattern.permute.xlu1 %v620_v4  ;;  %v586_v10 = vld [vmem:[%s854_s1 + $0x8] sm:$0xff]   ;;  %v45_v13 = vld [vmem:[%s855_s2 + $0x18] sm:$0xff] }
   0x5   :  { %v584_v6 = vld [vmem:[%s854_s1] sm:$0xff]   ;;  %60 = vperm.xlu0 %582, %v42_v2   ;;  %v587_v11 = vld [vmem:[%s854_s1 + $0x28] sm:$0xff]   ;;  %70 = vperm.xlu1 %583, %v44_v9   ;;  %v588_v14 = vld [vmem:[%s854_s1 + $0x10] sm:$0xff]  }
   0x6   :  { %v585_v7 = vld [vmem:[%s854_s1 + $0x20] sm:$0xff]   ;;  %578 = vmatprep.subr.msk.bf16.mxu0 %vm178_vm0, %v25_v3  ;;  %579 = vmatprep.subr.msk.bf16.mxu1 %vm178_vm0, %v25_v3  ;;  %v204_v8 = vsel %vm178_vm0, %v25_v3, 0  ;;  %v589_v15 = vld [vmem:[%s854_s1 + $0x30] sm:$0xff]   ;;  %v352_v17 = vld [vmem:[%s856_s3 + $0x8] sm:$0xff] }
   0x7   :  { %559 = vmatpush3.bf16.xpose.msra.mxu0 %v204_v8  ;;  %577 = vmatpush3.bf16.xpose.msra.mxu1 %v204_v8  ;;  %v351_v12 = vld [vmem:[%s856_s3] sm:$0xff]  ;;  %v590_v18 = vld [vmem:[%s854_s1 + $0x18] sm:$0xff]   ;;  %v47_v20 = vld [vmem:[%s855_s2 + $0x28] sm:$0xff] }
   0x8   :  { %560 = vmatprep.mubr.msk.bf16.mxu0 %vm178_vm0, %v584_v6  ;;  %568 = vmatprep.mubr.msk.bf16.mxu1 %vm178_vm0, %v585_v7  ;;  %v46_v16 = vld [vmem:[%s855_s2 + $0x20] sm:$0xff]  ;;  %v591_v19 = vld [vmem:[%s854_s1 + $0x38] sm:$0xff]   ;;  %v353_v21 = vld [vmem:[%s856_s3 + $0x10] sm:$0xff] }
   0x9   :  { %65 = vperm.xlu0 %582, %v43_v5   ;;  %75 = vperm.xlu1 %583, %v45_v13   ;;  %v48_v22 = vld [vmem:[%s855_s2 + $0x30] sm:$0xff]  ;;  %v354_v23 = vld [vmem:[%s856_s3 + $0x18] sm:$0xff] }
   0xd   :  { %369 = vperm.xlu0 %582, %v351_v12   ;;  %374 = vperm.xlu1 %583, %v352_v17  }
   0xe   :  { %561 = vmatmul.mubr.msk.bf16.vlgmr.msra.gmra.mrb[0].mxu0 %vm178_vm0, %v586_v10  ;;  %569 = vmatmul.mubr.msk.bf16.vlgmr.msra.gmra.mrb[0].mxu1 %vm178_vm0, %v587_v11 }
   0xf   :  { %564 = vmatprep.mubr.msk.bf16.mxu0 %vm178_vm0, %v588_v14  ;;  %572 = vmatprep.mubr.msk.bf16.mxu1 %vm178_vm0, %v589_v15 }
  0x11   :  { %80 = vperm.xlu0 %582, %v46_v16   ;;  %379 = vperm.xlu1 %583, %v353_v21  }
  0x15   :  { %85 = vperm.xlu0 %582, %v47_v20  }
  0x16   :  { %565 = vmatmul.mubr.msk.bf16.gmra.mrb[4].mxu0 %vm178_vm0, %v590_v18  ;;  %573 = vmatmul.mubr.msk.bf16.gmra.mrb[4].mxu1 %vm178_vm0, %v591_v19 }
  0x17   :  { %12 = vsyncpa [#allocation4], 0  ;;  %384 = vperm.xlu1 %583, %v354_v23   ;;  %v49_v24 = vld [vmem:[%s855_s2 + $0x38] sm:$0xff]  ;;  %v355_v25 = vld [vmem:[%s856_s3 + $0x20] sm:$0xff]  ;;  %vm463_vm5 = vcmask 64512  }
  0x18   :  { %v50_v26 = vld [vmem:[%s855_s2 + $0x40] sm:$0xff]  ;;  %v356_v27 = vld [vmem:[%s856_s3 + $0x28] sm:$0xff]  ;;  %v357_v29 = vld [vmem:[%s856_s3 + $0x30] sm:$0xff] }
  0x19   :  { %90 = vperm.xlu0 %582, %v48_v22   ;;  %v51_v28 = vld [vmem:[%s855_s2 + $0x48] sm:$0xff]  ;;  %v52_v30 = vld [vmem:[%s855_s2 + $0x50] sm:$0xff]  ;;  %v358_v31 = vld [vmem:[%s856_s3 + $0x38] sm:$0xff] }
  0x1a   :  { %v53_v32 = vld [vmem:[%s855_s2 + $0x58] sm:$0xff]  ;;  %v359_v33 = vld [vmem:[%s856_s3 + $0x40] sm:$0xff]  ;;  %v360_v35 = vld [vmem:[%s856_s3 + $0x48] sm:$0xff] }
  0x1b   :  { %389 = vperm.xlu1 %583, %v355_v25   ;;  %v54_v34 = vld [vmem:[%s855_s2 + $0x60] sm:$0xff]  ;;  %v55_v36 = vld [vmem:[%s855_s2 + $0x68] sm:$0xff]  ;;  %v361_v37 = vld [vmem:[%s856_s3 + $0x50] sm:$0xff] }
  0x1c   :  { %v56_v38 = vld [vmem:[%s855_s2 + $0x70] sm:$0xff]  ;;  %v362_v39 = vld [vmem:[%s856_s3 + $0x58] sm:$0xff]  ;;  %v363_v41 = vld [vmem:[%s856_s3 + $0x60] sm:$0xff] }
  0x1d   :  { %95 = vperm.xlu0 %582, %v49_v24   ;;  %v57_v40 = vld [vmem:[%s855_s2 + $0x78] sm:$0xff]  ;;  %v365_v42 = vld [vmem:[%s856_s3 + $0x70] sm:$0xff]  ;;  %v364_v43 = vld [vmem:[%s856_s3 + $0x68] sm:$0xff]  ;;  %s621_s2 = smov [#allocation3]  }
  0x1e   :  { %v501_v44 = vld [vmem:[#allocation2] sm:$0x1]  ;;  %v366_v45 = vld [vmem:[%s856_s3 + $0x78] sm:$0xff]  ;;  %s525_s3 = sshll.u32 %s621_s2, 4  ;;  %s526_s3 = int_to_ptr.vmem [resolvable:$true] %s525_s3 }
  0x1f   :  { %394 = vperm.xlu1 %583, %v356_v27   ;;  %s596_s19 = scalar_lea.vmem %s526_s3, 16  ;;  %s600_s20 = scalar_lea.vmem %s526_s3, 32 }
  0x20   :  { %p597_p0 = scmp.ne.s32.totalorder %s526_s3, %s596_s19  ;;  %p601_p1 = scmp.lt.s32.totalorder %s526_s3, %s526_s3 }
  0x21   :  { %100 = vperm.xlu0 %582, %v50_v26   ;;  %p602_p2 = scmp.lt.s32.totalorder %s600_s20, %s596_s19 }
  0x23   :  { %399 = vperm.xlu1 %583, %v357_v29   ;;  %p603_p3 = por %p602_p2, %p601_p1 }
  0x25   :  { %105 = vperm.xlu0 %582, %v51_v28   ;;  %p604_p4 = pnand %p603_p3, %p597_p0 }
  0x27   :  { %404 = vperm.xlu1 %583, %v358_v31  }
  0x29   :  { %110 = vperm.xlu0 %582, %v52_v30  }
  0x2b   :  { %409 = vperm.xlu1 %583, %v359_v33  }
  0x2d   :  { %115 = vperm.xlu0 %582, %v53_v32  }
  0x2f   :  { %414 = vperm.xlu1 %583, %v360_v35  }
  0x31   :  { %120 = vperm.xlu0 %582, %v54_v34  }
  0x33   :  { %419 = vperm.xlu1 %583, %v361_v37  }
  0x35   :  { %125 = vperm.xlu0 %582, %v55_v36  }
  0x37   :  { %424 = vperm.xlu1 %583, %v362_v39  }
  0x39   :  { %130 = vperm.xlu0 %582, %v56_v38  }
  0x3b   :  { %429 = vperm.xlu1 %583, %v363_v41  }
  0x3d   :  { %135 = vperm.xlu0 %582, %v57_v40  }
  0x3f   :  { %434 = vperm.xlu1 %583, %v364_v43  }
  0x41   :  { %439 = vperm.xlu0 %582, %v365_v42  }
  0x43   :  { %444 = vperm.xlu1 %583, %v366_v45  }
  0x45   :  { %504 = vperm.xlu0 %582, %v501_v44  }
  0x84   :  { %v61_v46 = vpop.permute.xlu0 %60  ;;  %v71_v48 = vpop.permute.xlu1 %70 }
  0x88   :  { %v66_v47 = vpop.permute.xlu0 %65  ;;  %v76_v50 = vpop.permute.xlu1 %75 }
  0x8c   :  { %v370_v49 = vpop.permute.xlu0 %369  ;;  %v375_v52 = vpop.permute.xlu1 %374 }
  0x90   :  { %v81_v51 = vpop.permute.xlu0 %80  ;;  %v380_v54 = vpop.permute.xlu1 %379 }
  0x94   :  { %v789_v53 = vpop.permute.xlu0 %85 }
  0x96   :  { %v385_v56 = vpop.permute.xlu1 %384 }
  0x98   :  { %v91_v55 = vpop.permute.xlu0 %90 }
  0x9a   :  { %v791_v58 = vpop.permute.xlu1 %389 }
  0x9c   :  { %v96_v57 = vpop.permute.xlu0 %95 }
  0x9e   :  { %v793_v60 = vpop.permute.xlu1 %394 }
  0xa0   :  { %v101_v59 = vpop.permute.xlu0 %100 }
  0xa2   :  { %v797_v62 = vpop.permute.xlu1 %399 }
  0xa4   :  { %v795_v61 = vpop.permute.xlu0 %105 }
  0xa6   :  { %v801_v0 = vpop.permute.xlu1 %404 }
  0xa8   :  { %v799_v63 = vpop.permute.xlu0 %110 }
  0xaa   :  { %v805_v13 = vpop.permute.xlu1 %409 }
  0xac   :  { %v116_v15 = vpop.permute.xlu0 %115 }
  0xae   :  { %v811_v30 = vpop.permute.xlu1 %414 }
  0xb0   :  { %v121_v33 = vpop.permute.xlu0 %120 }
  0xe1   :  { %v562_v1 = vpop.f32.mrb[0].mxu0  ;;  %v570_v2 = vpop.f32.mrb[0].mxu1 }
  0xe2   :  { %v240_v3 = vpop.f32.mrb[1].mxu0  ;;  %v272_v4 = vpop.f32.mrb[1].mxu1  ;;  %v249_v8 = vadd.f32 %v562_v1, %v71_v48 }
  0xe3   :  { %v241_v5 = vadd.f32 %v240_v3, %v61_v46  ;;  %v563_v6 = vpop.f32.mrb[2].mxu0  ;;  %v803_v7 = vpop.f32.mrb[2].mxu1  ;;  %v273_v45 = vadd.f32 %v272_v4, %v101_v59 }
  0xe4   :  { %v252_v10 = vadd.f32 %v563_v6, %v76_v50  ;;  %v243_v11 = vpop.f32.mrb[3].mxu0  ;;  %v275_v12 = vpop.f32.mrb[3].mxu1  ;;  %v321_v14 = vmul.f32 0.1, %v249_v8  ;;  %vm305_vm2 = vcmp.gt.f32.partialorder %v249_v8, 0.0 }
  0xe5   :  { %v319_v9 = vmul.f32 0.1, %v241_v5  ;;  %vm303_vm1 = vcmp.gt.f32.partialorder %v241_v5, 0.0  ;;  %v244_v19 = vadd.f32 %v243_v11, %v66_v47  ;;  %v420_v46 = vpop.permute.xlu1 %419  ;;  %v126_v50 = vpop.permute.xlu0 %125  ;;  %v327_v3 = vmul.f32 0.1, %v273_v45 }
  0xe6   :  { %v322_v18 = vmul.f32 0.1, %v252_v10  ;;  %vm306_vm3 = vcmp.gt.f32.partialorder %v252_v10, 0.0  ;;  %v337_v24 = vsel %vm305_vm2, %v249_v8, %v321_v14  ;;  %vm311_vm10 = vcmp.gt.f32.partialorder %v273_v45, 0.0 }
  0xe7   :  { %v335_v17 = vsel %vm303_vm1, %v241_v5, %v319_v9  ;;  %vm304_vm4 = vcmp.gt.f32.partialorder %v244_v19, 0.0  ;;  %v320_v25 = vmul.f32 0.1, %v244_v19  ;;  %v449_v34 = vmul.f32 %v380_v54, %v337_v24 }
  0xe8   :  { %v447_v28 = vmul.f32 %v370_v49, %v335_v17  ;;  %v338_v31 = vsel %vm306_vm3, %v252_v10, %v322_v18  ;;  %vm517_vm2 = vcmask 57344  }
  0xe9   :  { %v566_v16 = vpop.f32.mrb[4].mxu0  ;;  %v807_v20 = vpop.f32.mrb[4].mxu1  ;;  %v336_v32 = vsel %vm304_vm4, %v244_v19, %v320_v25  ;;  %v450_v39 = vmul.f32 %v385_v56, %v338_v31  ;;  %v467_v44 = vsel %vm463_vm5, %v449_v34, 0.0 }
  0xea   :  { %v256_v21 = vpop.f32.mrb[5].mxu0  ;;  %v288_v22 = vpop.f32.mrb[5].mxu1  ;;  %v448_v35 = vmul.f32 %v375_v52, %v336_v32  ;;  %v265_v37 = vadd.f32 %v566_v16, %v91_v55  ;;  %v464_v38 = vsel %vm463_vm5, %v447_v28, 0.0  ;;  %v276_v55 = vadd.f32 %v275_v12, %v795_v61 }
  0xeb   :  { %v567_v23 = vpop.f32.mrb[6].mxu0  ;;  %v809_v26 = vpop.f32.mrb[6].mxu1  ;;  %v257_v36 = vadd.f32 %v256_v21, %v81_v51  ;;  %v469_v51 = vsel %vm463_vm5, %v450_v39, 0.0  ;;  %v343_v12 = vsel %vm311_vm10, %v273_v45, %v327_v3  ;;  %v289_v14 = vadd.f32 %v288_v22, %v121_v33 }
  0xec   :  { %v259_v27 = vpop.f32.mrb[7].mxu0  ;;  %v291_v29 = vpop.f32.mrb[7].mxu1  ;;  %v465_v40 = vsel %vm463_vm5, %v448_v35, 0.0  ;;  %v268_v43 = vadd.f32 %v567_v23, %v96_v57  ;;  %v325_v48 = vmul.f32 0.1, %v265_v37  ;;  %vm309_vm7 = vcmp.gt.f32.partialorder %v265_v37, 0.0 }
  0xed   :  { %vm307_vm6 = vcmp.gt.f32.partialorder %v257_v36, 0.0  ;;  %v466_v41 = vadd.f32 %v465_v40, %v464_v38  ;;  %v323_v42 = vmul.f32 0.1, %v257_v36  ;;  %v260_v54 = vadd.f32 %v259_v27, %v789_v53  ;;  %v425_v8 = vpop.permute.xlu1 %424  ;;  %v131_v61 = vpop.permute.xlu0 %130 }
  0xee   :  { %v326_v1 = vmul.f32 0.1, %v268_v43  ;;  %v281_v57 = vadd.f32 %v570_v2, %v799_v63  ;;  %vm310_vm8 = vcmp.gt.f32.partialorder %v268_v43, 0.0  ;;  %v341_v4 = vsel %vm309_vm7, %v265_v37, %v325_v48 }
  0xef   :  { %v468_v47 = vadd.f32 %v467_v44, %v466_v41  ;;  %v339_v49 = vsel %vm307_vm6, %v257_v36, %v323_v42  ;;  %vm308_vm9 = vcmp.gt.f32.partialorder %v260_v54, 0.0  ;;  %v324_v6 = vmul.f32 0.1, %v260_v54 }
  0xf0   :  { %v451_v52 = vmul.f32 %v791_v58, %v339_v49  ;;  %v284_v58 = vadd.f32 %v803_v7, %v116_v15  ;;  %v328_v9 = vmul.f32 0.1, %v276_v55  ;;  %v342_v53 = vsel %vm310_vm8, %v268_v43, %v326_v1 }
  0xf1   :  { %v470_v56 = vadd.f32 %v469_v51, %v468_v47  ;;  %v340_v10 = vsel %vm308_vm9, %v260_v54, %v324_v6  ;;  %vm312_vm11 = vcmp.gt.f32.partialorder %v276_v55, 0.0  ;;  %v453_v11 = vmul.f32 %v797_v62, %v341_v4  ;;  %v430_v62 = vpop.permute.xlu1 %429  ;;  %v136_v27 = vpop.permute.xlu0 %135 }
  0xf2   :  { %v471_v59 = vsel %vm463_vm5, %v451_v52, 0.0  ;;  %v452_v63 = vmul.f32 %v793_v60, %v340_v10  ;;  %v329_v2 = vmul.f32 0.1, %v281_v57  ;;  %vm313_vm12 = vcmp.gt.f32.partialorder %v281_v57, 0.0 }
  0xf3   :  { %v472_v5 = vadd.f32 %v471_v59, %v470_v56  ;;  %v454_v16 = vmul.f32 %v801_v0, %v342_v53  ;;  %v330_v18 = vmul.f32 0.1, %v284_v58  ;;  %v344_v19 = vsel %vm312_vm11, %v276_v55, %v328_v9 }
  0xf4   :  { %v473_v17 = vsel %vm463_vm5, %v452_v63, 0.0  ;;  %v292_v15 = vadd.f32 %v291_v29, %v126_v50  ;;  %v455_v21 = vmul.f32 %v805_v13, %v343_v12  ;;  %vm314_vm13 = vcmp.gt.f32.partialorder %v284_v58, 0.0 }
  0xf5   :  { %v474_v7 = vadd.f32 %v473_v17, %v472_v5  ;;  %v475_v23 = vsel %vm463_vm5, %v453_v11, 0.0  ;;  %v345_v24 = vsel %vm313_vm12, %v281_v57, %v329_v2  ;;  %v297_v60 = vadd.f32 %v807_v20, %v131_v61  ;;  %v440_v47 = vpop.permute.xlu0 %439 }
  0xf6   :  { %v331_v25 = vmul.f32 0.1, %v289_v14  ;;  %v456_v0 = vmul.f32 %v811_v30, %v344_v19  ;;  %vm315_vm14 = vcmp.gt.f32.partialorder %v289_v14, 0.0  ;;  %v477_v28 = vsel %vm463_vm5, %v454_v16, 0.0  ;;  %v435_v30 = vpop.permute.xlu1 %434 }
  0xf7   :  { %v476_v22 = vadd.f32 %v475_v23, %v474_v7  ;;  %v346_v31 = vsel %vm314_vm13, %v284_v58, %v330_v18  ;;  %v300_v29 = vadd.f32 %v809_v26, %v136_v27  ;;  %v332_v13 = vmul.f32 0.1, %v292_v15 }
  0xf8   :  { %v457_v33 = vmul.f32 %v420_v46, %v345_v24  ;;  %v479_v34 = vsel %vm463_vm5, %v455_v21, 0.0  ;;  %vm316_vm15 = vcmp.gt.f32.partialorder %v292_v15, 0.0  ;;  %v333_v35 = vmul.f32 0.1, %v297_v60 }
  0xf9   :  { %v478_v32 = vadd.f32 %v477_v28, %v476_v22  ;;  %v347_v36 = vsel %vm315_vm14, %v289_v14, %v331_v25  ;;  %v458_v37 = vmul.f32 %v425_v8, %v346_v31  ;;  %v481_v38 = vsel %vm463_vm5, %v456_v0, 0.0  ;;  %v505_v61 = vpop.permute.xlu0 %504 }
  0xfa   :  { %vm317_vm0 = vcmp.gt.f32.partialorder %v297_v60, 0.0  ;;  %v334_v39 = vmul.f32 0.1, %v300_v29  ;;  %v348_v40 = vsel %vm316_vm15, %v292_v15, %v332_v13  ;;  %v483_v42 = vsel %vm463_vm5, %v457_v33, 0.0  ;;  %v445_v52 = vpop.permute.xlu1 %444 }
  0xfb   :  { %v480_v20 = vadd.f32 %v479_v34, %v478_v32  ;;  %v459_v26 = vmul.f32 %v430_v62, %v347_v36  ;;  %vm318_vm1 = vcmp.gt.f32.partialorder %v300_v29, 0.0  ;;  %v349_v43 = vsel %vm317_vm0, %v297_v60, %v333_v35 }
  0xfc   :  { %v485_v45 = vsel %vm463_vm5, %v458_v37, 0.0  ;;  %v460_v46 = vmul.f32 %v435_v30, %v348_v40  ;;  %v350_v48 = vsel %vm318_vm1, %v300_v29, %v334_v39  ;;  %v461_v50 = vmul.f32 %v440_v47, %v349_v43 }
  0xfd   :  { %v482_v41 = vadd.f32 %v481_v38, %v480_v20  ;;  %v487_v51 = vsel %vm463_vm5, %v459_v26, 0.0  ;;  %v462_v55 = vmul.f32 %v445_v52, %v350_v48  ;;  %v507_v4 = vlaneseq }
  0xfe   :  { %v489_v56 = vsel %vm463_vm5, %v460_v46, 0.0  ;;  %v491_v57 = vsel %vm463_vm5, %v461_v50, 0.0 }
  0xff   :  { %v484_v44 = vadd.f32 %v483_v42, %v482_v41  ;;  %v493_v59 = vsel %vm463_vm5, %v462_v55, 0.0  ;;  %v508_v8 = vshrl.u32 %v507_v4, 7 }
 0x101   :  { %v486_v49 = vadd.f32 %v485_v45, %v484_v44  ;;  %v509_v53 = vsub.s32 0, %v508_v8 }
 0x103   :  { %v488_v54 = vadd.f32 %v487_v51, %v486_v49  ;;  %v510_v63 = vrot.slane %v505_v61, %v509_v53 }
 0x105   :  { %v490_v1 = vadd.f32 %v489_v56, %v488_v54 }
 0x107   :  { %v492_v3 = vadd.f32 %v491_v57, %v490_v1 }
 0x109   :  { %v494_v5 = vadd.f32 %v493_v59, %v492_v3 }
 0x10b   :  { %v495_v6 = vrot.slane %v494_v5, 4 }
 0x10d   :  { %v496_v58 = vadd.f32 %v495_v6, %v494_v5 }
 0x10f   :  { %v497_v9 = vrot.slane %v496_v58, 2 }
 0x111   :  { %v498_v10 = vadd.f32 %v497_v9, %v496_v58 }
 0x113   :  { %v499_v11 = vrot.slane %v498_v10, 1 }
 0x115   :  { %v500_v2 = vadd.f32 %v499_v11, %v498_v10 }
 0x117   :  { %v511_v12 = vadd.f32 %v510_v63, %v500_v2 }
 0x119   :  { %v512_v14 = vsub.f32 0.0, %v511_v12 }
 0x11b   :  { %v513_v16 = vmul.f32 1.442695, %v512_v14 }
 0x11d   :  { %592 = vpow2.f32 %v513_v16 }
 0x127   :  { %v593_v17 = vpop.eup %592 }
 0x128   :  { %v515_v18 = vadd.f32 1.0, %v593_v17 }
 0x12a   :  { %594 = vrcp.f32 %v515_v18 }
 0x134   :  { %v595_v19 = vpop.eup %594 }
 0x135   :  { %518 = vst.msk [vmem:[#allocation3] sm:$0x1] %vm517_vm2, %v595_v19 }
 0x136   :  { %607 = shalt.err (!%p604_p4)
}
 0x137   :  { %s608_s23 = scalar_lea.hbm %s858_s5, 16 }
 0x138   :  { %p609_p5 = scmp.ne.s32.totalorder %s858_s5, %s608_s23  ;;  %p612_p6 = scmp.lt.u32.totalorder %s608_s23, %s858_s5 }
 0x13a   :  { %p614_p7 = pnand %p612_p6, %p609_p5 }
 0x13c   :  { %617 = shalt.err (!%p614_p7)
}
 0x13d   :  { %528 = dma.vmem_to_hbm [thread:$0]  %s526_s3, 16, %s858_s5, [#allocation4]  }
 0x13e   :  { %618 = dma.done.wait [#allocation4], 16  }
 0x13f   :  { %619 = vsyncadd [#allocation4], 4294967280 }
 0x140   :  { %532 = vsyncpa [#allocation4], 1 }

</bundles_post_ra>
